<compile_context>
chip_gen: v6e
topology: v6e:2x2x1
jax: 0.10.0
libtpu: 0.0.40
codegen_flags: <defaults>
</compile_context>

<pallas_src>
import functools

import numpy as np
import jax
import jax.numpy as jnp
from jax.experimental import pallas as pl
from jax.experimental.pallas import tpu as pltpu


def _round_up(x, m):
    return ((x + m - 1) // m) * m


def _cdiv(a, b):
    return -(-a // b)


def _vmem_budget():
    """Generation-aware VMEM sizing (v5e/v6e: 128 MiB, v7x: 64 MiB per TC)."""
    try:
        cap = pltpu.get_tpu_info().vmem_capacity_bytes
    except Exception:  # interpret mode / older jax: fall back to the smallest (v7x)
        cap = None
    if not cap:
        cap = 64 * 1024 * 1024
    limit = int(min((cap * 3) // 4, 96 * 1024 * 1024))      # 96 MiB v5e/v6e, 48 MiB v7x
    budget = int(max(limit - 8 * 1024 * 1024, limit // 2))  # headroom for compiler scratch
    return limit, budget


_VMEM_LIMIT, _TILE_BUDGET = _vmem_budget()
_LOGITS_DTYPE = jnp.float32  # set to jnp.bfloat16 to halve logits write-back if loss allows


def _pick_tn(n_pad):
    for t in (512, 256, 128):
        if n_pad % t == 0:
            return t
    return n_pad  # unreachable: n_pad is always a multiple of 128


def _pick_tm(m, bytes_per_row, budget, max_tm=1024, min_blocks=1):
    """Row tile: multiple of 16, VMEM-bounded, >=min_blocks grid blocks, minimal pad waste."""
    m16 = _round_up(max(m, 16), 16)
    tm = min(max_tm, m16)
    if min_blocks > 1 and m16 >= 16 * min_blocks:
        tm = min(tm, _round_up(_cdiv(m16, min_blocks), 16))
    cap = (max(budget, 16 * bytes_per_row) // max(bytes_per_row, 1)) // 16 * 16
    return max(16, min(tm, cap))


# ----------------------------------------------------------------------------
# Pallas kernels
# ----------------------------------------------------------------------------
def _decoder_kernel(half, x_ref, w_ref, b_ref, o_ref):
    # grid = (row tile i, col tile j, direction d); d is innermost so the
    # weight tile (block index (0, j)) is NOT re-fetched between the two
    # directions, and the activation row tile (block index (i, 0)) stays
    # resident across the whole (j, d) sweep.
    d = pl.program_id(2)
    xf = x_ref[...]                                            # (tm, 2*half) f32
    x = jnp.where(d == 0, xf[:, :half], xf[:, half:]).astype(jnp.bfloat16)
    acc = jnp.dot(x, w_ref[...], preferred_element_type=jnp.float32)
    o_ref[0, :, :] = (acc + b_ref[...]).astype(o_ref.dtype)


def _linear_kernel(x_ref, w_ref, b_ref, o_ref):
    x = x_ref[...].astype(jnp.bfloat16)                        # f32 in HBM, bf16 on MXU
    acc = jnp.dot(x, w_ref[...], preferred_element_type=jnp.float32)
    o_ref[...] = (acc + b_ref[...]).astype(o_ref.dtype)


def _bilm_two_layer_kernel(x_ref, w1_ref, b1_ref, w2_ref, b2_ref, m_ref,
                           o1_ref, o2_ref):
    # Fused: layer1 = tanh(x@w1+b1)*m ; layer2 = tanh(layer1@w2+b2)*m.
    # layer1 never leaves VMEM between the two matmuls; the mask broadcast is
    # hoisted and reused (JAX does not CSE broadcast_in_dim).
    mb = jnp.broadcast_to(m_ref[...], o1_ref.shape)            # (tm, D) f32, built once
    x = x_ref[...].astype(jnp.bfloat16)
    h1 = jnp.tanh(
        jnp.dot(x, w1_ref[...], preferred_element_type=jnp.float32)
        + b1_ref[...]) * mb
    o1_ref[...] = h1.astype(o1_ref.dtype)
    h2 = jnp.tanh(
        jnp.dot(h1.astype(jnp.bfloat16), w2_ref[...],
                preferred_element_type=jnp.float32)
        + b2_ref[...]) * mb
    o2_ref[...] = h2.astype(o2_ref.dtype)


# ----------------------------------------------------------------------------
# Wrappers
# ----------------------------------------------------------------------------
def pallas_bilm_layers(x, w1_bf16, b1, w2_bf16, b2, maskf):
    """Fused two tanh projections with in-kernel mask epilogue.

    x: (B, T, D) f32 ; w*: (D, D) bf16 (cast at init) ; b*: (D,) f32 ;
    maskf: (B, T) f32. Returns (layer1, layer2) each (B, T, D) f32.
    """
    B, T, D = x.shape
    M = B * T
    x2 = x.reshape(M, D)                        # stays f32; cast happens in-kernel
    m2 = maskf.reshape(M, 1).astype(jnp.float32)
    b1f = b1.reshape(1, D).astype(jnp.float32)
    b2f = b2.reshape(1, D).astype(jnp.float32)

    bytes_per_row = (3 * D * 4 + 4) * 2         # x + 2 outputs + mask, double-buffered
    fixed = (2 * D * D * 2 + 2 * D * 4) * 2     # resident bf16 w1/w2 + biases
    tm = _pick_tm(M, bytes_per_row, _TILE_BUDGET - fixed, max_tm=512, min_blocks=2)
    m_pad = _round_up(M, tm)
    if m_pad != M:
        x2 = jnp.pad(x2, ((0, m_pad - M), (0, 0)))
        m2 = jnp.pad(m2, ((0, m_pad - M), (0, 0)))

    out1, out2 = pl.pallas_call(
        _bilm_two_layer_kernel,
        out_shape=(jax.ShapeDtypeStruct((m_pad, D), jnp.float32),
                   jax.ShapeDtypeStruct((m_pad, D), jnp.float32)),
        grid=(m_pad // tm,),
        in_specs=[
            pl.BlockSpec((tm, D), lambda i: (i, 0)),   # x row tile (f32)
            pl.BlockSpec((D, D), lambda i: (0, 0)),    # w1 (resident)
            pl.BlockSpec((1, D), lambda i: (0, 0)),    # b1
            pl.BlockSpec((D, D), lambda i: (0, 0)),    # w2 (resident)
            pl.BlockSpec((1, D), lambda i: (0, 0)),    # b2
            pl.BlockSpec((tm, 1), lambda i: (i, 0)),   # mask row tile
        ],
        out_specs=(pl.BlockSpec((tm, D), lambda i: (i, 0)),
                   pl.BlockSpec((tm, D), lambda i: (i, 0))),
        compiler_params=pltpu.CompilerParams(
            dimension_semantics=("parallel",),
            vmem_limit_bytes=_VMEM_LIMIT),
    )(x2, w1_bf16, b1f, w2_bf16, b2f, m2)

    return out1[:M].reshape(B, T, D), out2[:M].reshape(B, T, D)


def pallas_decoder(last, dec_w_pad, dec_b_pad, half, vocab, logits_dtype=_LOGITS_DTYPE):
    """Shared fwd/bwd decoder: logits_d = last[..., d*half:(d+1)*half] @ W + b.

    last: (B, T, 2*half) f32 ; dec_w_pad: (half, n_pad) bf16 padded at init ;
    dec_b_pad: (1, n_pad) f32 padded at init. Returns two (B, T, vocab) arrays.
    """
    B, T, D = last.shape
    M = B * T
    n_pad = dec_w_pad.shape[1]
    tn = _pick_tn(n_pad)
    out_bytes = np.dtype(logits_dtype).itemsize
    x2 = last.reshape(M, D)

    if half % 128 == 0:
        # Fused-direction path: no concat/split copies around the kernel.
        bytes_per_row = (D * 4 + tn * out_bytes) * 2
        fixed = (half * tn * 2 + tn * 4) * 2
        tm = _pick_tm(M, bytes_per_row, _TILE_BUDGET - fixed, max_tm=1024, min_blocks=1)
        m_pad = _round_up(M, tm)
        if m_pad != M:
            x2 = jnp.pad(x2, ((0, m_pad - M), (0, 0)))
        out = pl.pallas_call(
            functools.partial(_decoder_kernel, half),
            out_shape=jax.ShapeDtypeStruct((2, m_pad, n_pad), logits_dtype),
            grid=(m_pad // tm, n_pad // tn, 2),
            in_specs=[
                # Row tile: block index ignores (j, d) -> fetched once per i.
                pl.BlockSpec((tm, D), lambda i, j, d: (i, 0)),
                # Shared decoder weight / bias column tiles.
                pl.BlockSpec((half, tn), lambda i, j, d: (0, j)),
                pl.BlockSpec((1, tn), lambda i, j, d: (0, j)),
            ],
            out_specs=pl.BlockSpec((1, tm, tn), lambda i, j, d: (d, i, j)),
            # d kept "arbitrary" so megacore shards i/j (preserving the
            # weight-reuse across directions); i/j are parallel.
            compiler_params=pltpu.CompilerParams(
                dimension_semantics=("parallel", "parallel", "arbitrary"),
                vmem_limit_bytes=_VMEM_LIMIT),
        )(x2, dec_w_pad, dec_b_pad)
        lf = out[0, :M, :vocab].reshape(B, T, vocab)
        lb = out[1, :M, :vocab].reshape(B, T, vocab)
        return lf, lb

    # Fallback for non-lane-aligned feature halves: merge both directions on M.
    merged = jnp.concatenate([x2[:, :half], x2[:, half:]], axis=0)     # (2M, half)
    M2 = 2 * M
    bytes_per_row = (half * 4 + tn * out_bytes) * 2
    fixed = (half * tn * 2 + tn * 4) * 2
    tm = _pick_tm(M2, bytes_per_row, _TILE_BUDGET - fixed, max_tm=1024, min_blocks=2)
    m_pad = _round_up(M2, tm)
    if m_pad != M2:
        merged = jnp.pad(merged, ((0, m_pad - M2), (0, 0)))
    out = pl.pallas_call(
        _linear_kernel,
        out_shape=jax.ShapeDtypeStruct((m_pad, n_pad), logits_dtype),
        grid=(m_pad // tm, n_pad // tn),
        in_specs=[
            pl.BlockSpec((tm, half), lambda i, j: (i, 0)),
            pl.BlockSpec((half, tn), lambda i, j: (0, j)),
            pl.BlockSpec((1, tn), lambda i, j: (0, j)),
        ],
        out_specs=pl.BlockSpec((tm, tn), lambda i, j: (i, j)),
        compiler_params=pltpu.CompilerParams(
            dimension_semantics=("parallel", "parallel"),
            vmem_limit_bytes=_VMEM_LIMIT),
    )(merged, dec_w_pad, dec_b_pad)
    lf = out[:M, :vocab].reshape(B, T, vocab)
    lb = out[M:2 * M, :vocab].reshape(B, T, vocab)
    return lf, lb


# ----------------------------------------------------------------------------
# allennlp.nn.util.remove_sentence_boundaries (JAX glue, same semantics)
# ----------------------------------------------------------------------------
def remove_sentence_boundaries(tensor, mask):
    """tensor: (B, T, D), mask: (B, T) int. Drops BOS/EOS per sequence."""
    B, T, D = tensor.shape
    lengths = mask.sum(axis=1)                       # includes bos/eos
    new_t = T - 2
    t_idx = jnp.arange(new_t)
    keep = t_idx[None, :] < (lengths[:, None] - 2)   # (B, new_t)
    shifted = tensor[:, 1:T - 1, :]                  # drop first position, shift by 1
    new_tensor = jnp.where(keep[:, :, None], shifted, 0.0)
    new_mask = keep.astype(jnp.int32)
    return new_tensor, new_mask


# ----------------------------------------------------------------------------
# Synthetic ElmoBiLm stand-in (deterministic params, Pallas matmuls).
# ----------------------------------------------------------------------------
def _build_layer0(token_ids, lengths, params):
    """Token embedding + BOS/EOS insertion (plain-JAX gather); returns (layer0, mask)."""
    E = params["embedding"]           # (vocab, half)
    bos_emb = params["bos_emb"]       # (half,)
    eos_emb = params["eos_emb"]       # (half,)
    B, T_core = token_ids.shape
    T = T_core + 2

    pos = jnp.arange(T)[None, :]                                   # (1, T)
    is_bos = (pos == 0)
    is_eos = (pos == (lengths[:, None] + 1))
    is_tok = (pos >= 1) & (pos <= lengths[:, None])

    tok_emb = jnp.take(E, token_ids, axis=0)                       # (B, T_core, half)
    tok_idx = jnp.clip(jnp.broadcast_to(pos - 1, (B, T)), 0, T_core - 1)
    gathered = jax.vmap(lambda e, idx: e[idx])(tok_emb, tok_idx)   # (B, T, half)

    emb = jnp.where(is_bos[:, :, None], bos_emb[None, None, :],
          jnp.where(is_eos[:, :, None], eos_emb[None, None, :],
          jnp.where(is_tok[:, :, None], gathered, 0.0)))           # (B, T, half)

    mask_with_bos_eos = (pos <= lengths[:, None] + 1).astype(jnp.int32)  # (B, T)
    maskf = mask_with_bos_eos.astype(jnp.float32)
    # Layer 0: token representation duplicated across fwd/bwd halves (ELMo convention).
    layer0 = jnp.concatenate([emb, emb], axis=-1) * maskf[:, :, None]    # (B, T, D)
    return layer0, mask_with_bos_eos


def synthetic_elmo_bilm(token_ids, lengths, params):
    """Returns {'activations': [...], 'mask': mask_with_bos_eos}."""
    layer0, mask_with_bos_eos = _build_layer0(token_ids, lengths, params)
    maskf = mask_with_bos_eos.astype(jnp.float32)
    # Two "biLSTM" layers replaced by deterministic tanh projections, fused into a
    # single Pallas kernel with the mask epilogue applied in-kernel.
    layer1, layer2 = pallas_bilm_layers(
        layer0, params["w1"], params["b1"], params["w2"], params["b2"], maskf)
    return {"activations": [layer0, layer1, layer2], "mask": mask_with_bos_eos}


# ----------------------------------------------------------------------------
# Parameter preparation (run ONCE, outside jit): bf16 casts + decoder padding.
# ----------------------------------------------------------------------------
def prepare_params(raw):
    half, vocab = raw["dec_w"].shape
    n_pad = _round_up(vocab, 128)
    dec_w = raw["dec_w"].astype(jnp.bfloat16)
    dec_b = raw["dec_b"].astype(jnp.float32).reshape(1, vocab)
    if n_pad != vocab:
        dec_w = jnp.pad(dec_w, ((0, 0), (0, n_pad - vocab)))
        dec_b = jnp.pad(dec_b, ((0, 0), (0, n_pad - vocab)))
    p = dict(raw)
    p["w1"] = raw["w1"].astype(jnp.bfloat16)
    p["w2"] = raw["w2"].astype(jnp.bfloat16)
    p["dec_w"] = dec_w
    p["dec_b"] = dec_b
    return p


# ----------------------------------------------------------------------------
# ELMoLM.forward
# ----------------------------------------------------------------------------
@functools.partial(jax.jit, static_argnames=("output_dim_half", "vocab_size"))
def elmo_lm_forward(token_ids, lengths, params, output_dim_half, vocab_size):
    bilm_output = synthetic_elmo_bilm(token_ids, lengths, params)
    layer_activations = bilm_output["activations"]
    mask_with_bos_eos = bilm_output["mask"]

    representations = []
    mask = None
    for representation in layer_activations:
        r, mask = remove_sentence_boundaries(representation, mask_with_bos_eos)
        representations.append(r)

    last = representations[-1]
    # Shared decoder for both directions in a single pallas_call (no concat/split).
    logits_forward, logits_backward = pallas_decoder(
        last, params["dec_w"], params["dec_b"], output_dim_half, vocab_size)
    return logits_forward, logits_backward, representations, mask


# ----------------------------------------------------------------------------
if __name__ == "__main__":
    key = jax.random.PRNGKey(0)
    B, T_core = 2, 8
    vocab_size = 256
    output_dim = 256          # lane-aligned (half = 128) -> fused-direction decoder path
    half = output_dim // 2

    ks = jax.random.split(key, 10)
    raw_params = {
        "embedding": 0.1 * jax.random.normal(ks[0], (vocab_size, half), jnp.float32),
        "bos_emb":   0.1 * jax.random.normal(ks[1], (half,), jnp.float32),
        "eos_emb":   0.1 * jax.random.normal(ks[2], (half,), jnp.float32),
        "w1": 0.1 * jax.random.normal(ks[3], (output_dim, output_dim), jnp.float32),
        "b1": 0.01 * jax.random.normal(ks[4], (output_dim,), jnp.float32),
        "w2": 0.1 * jax.random.normal(ks[5], (output_dim, output_dim), jnp.float32),
        "b2": 0.01 * jax.random.normal(ks[6], (output_dim,), jnp.float32),
        # decoder: nn.Linear(half, vocab_size), stored transposed (half, vocab)
        "dec_w": 0.1 * jax.random.normal(ks[7], (half, vocab_size), jnp.float32),
        "dec_b": 0.01 * jax.random.normal(ks[8], (vocab_size,), jnp.float32),
    }
    params = prepare_params(raw_params)   # bf16 cast + decoder padding hoisted out of jit

    token_ids = jax.random.randint(ks[9], (B, T_core), 0, vocab_size, dtype=jnp.int32)
    lengths = jnp.array([T_core, T_core - 3], dtype=jnp.int32)  # second example is padded

    logits_fwd, logits_bwd, representations, mask = elmo_lm_forward(
        token_ids, lengths, params, half, vocab_size)
    jax.block_until_ready((logits_fwd, logits_bwd, representations, mask))

    # Pure-JAX f32 reference (tolerance check: bf16 MXU operands drift slightly).
    layer0_ref, mask_be = _build_layer0(token_ids, lengths, raw_params)
    m3 = mask_be.astype(jnp.float32)[:, :, None]
    h1 = jnp.tanh(layer0_ref @ raw_params["w1"] + raw_params["b1"]) * m3
    h2 = jnp.tanh(h1 @ raw_params["w2"] + raw_params["b2"]) * m3
    last_ref, _ = remove_sentence_boundaries(h2, mask_be)
    ref_fwd = last_ref[:, :, :half] @ raw_params["dec_w"] + raw_params["dec_b"]
    ref_bwd = last_ref[:, :, half:] @ raw_params["dec_w"] + raw_params["dec_b"]
    err = max(float(jnp.max(jnp.abs(logits_fwd.astype(jnp.float32) - ref_fwd))),
              float(jnp.max(jnp.abs(logits_bwd.astype(jnp.float32) - ref_bwd))))
    assert err < 0.1, f"max |pallas - ref| = {err}"

    assert logits_fwd.shape == (B, T_core, vocab_size)
    assert logits_bwd.shape == (B, T_core, vocab_size)
    assert representations[-1].shape == (B, T_core, output_dim)
    assert mask.shape == (B, T_core)
    print("KERNEL_OK")
</pallas_src>

<mosaic_0001>
module attributes {stable_mosaic.version = 11 : i64} {
  func.func @_decoder_kernel(%arg0: i32, %arg1: i32, %arg2: i32, %arg3: memref<16x256xf32, #tpu.memory_space<vmem>>, %arg4: memref<128x256xbf16, #tpu.memory_space<vmem>>, %arg5: memref<1x256xf32, #tpu.memory_space<vmem>>, %arg6: memref<1x16x256xf32, #tpu.memory_space<vmem>>) attributes {dimension_semantics = [#tpu.dimension_semantics<parallel>, #tpu.dimension_semantics<parallel>, #tpu.dimension_semantics<arbitrary>], iteration_bounds = array<i64: 1, 1, 2>, scalar_prefetch = 0 : i64, scratch_operands = 0 : i64, tpu.core_type = #tpu.core_type<tc>, window_params = [{transform_indices = @transform_0, window_bounds = array<i64: 16, 256>}, {transform_indices = @transform_1, window_bounds = array<i64: 128, 256>}, {transform_indices = @transform_2, window_bounds = array<i64: 1, 256>}, {transform_indices = @transform_3, window_bounds = array<i64: 1, 16, 256>}]} {
    %c0 = arith.constant 0 : index
    %c0_0 = arith.constant 0 : index
    %0 = vector.load %arg3[%c0, %c0_0] : memref<16x256xf32, #tpu.memory_space<vmem>>, vector<16x256xf32>
    %c0_i32 = arith.constant 0 : i32
    %1 = arith.cmpi eq, %arg2, %c0_i32 : i32
    %2 = vector.extract_strided_slice %0 {offsets = [0, 0], sizes = [16, 128], strides = [1, 1]} : vector<16x256xf32> to vector<16x128xf32>
    %3 = vector.extract_strided_slice %0 {offsets = [0, 128], sizes = [16, 128], strides = [1, 1]} : vector<16x256xf32> to vector<16x128xf32>
    %4 = arith.select %1, %2, %3 : vector<16x128xf32>
    %5 = arith.truncf %4 : vector<16x128xf32> to vector<16x128xbf16>
    %c0_1 = arith.constant 0 : index
    %c0_2 = arith.constant 0 : index
    %6 = vector.load %arg4[%c0_1, %c0_2] : memref<128x256xbf16, #tpu.memory_space<vmem>>, vector<128x256xbf16>
    %cst = arith.constant dense<0.000000e+00> : vector<16x256xf32>
    %7 = tpu.matmul %5, %6, %cst {dimension_numbers = #tpu.dot_dimension_numbers<[1], [0], [0], [1], [0, 0, 1, 1], [], []>} : vector<16x128xbf16>, vector<128x256xbf16>, vector<16x256xf32> -> vector<16x256xf32>
    %c0_3 = arith.constant 0 : index
    %c0_4 = arith.constant 0 : index
    %8 = vector.load %arg5[%c0_3, %c0_4] : memref<1x256xf32, #tpu.memory_space<vmem>>, vector<1x256xf32>
    %9 = vector.broadcast %8 : vector<1x256xf32> to vector<16x256xf32>
    %10 = arith.addf %7, %9 : vector<16x256xf32>
    %c0_5 = arith.constant 0 : index
    %c0_6 = arith.constant 0 : index
    %c0_7 = arith.constant 0 : index
    %11 = vector.load %arg6[%c0_5, %c0_6, %c0_7] : memref<1x16x256xf32, #tpu.memory_space<vmem>>, vector<1x16x256xf32>
    %12 = vector.shape_cast %11 : vector<1x16x256xf32> to vector<16x256xf32>
    %13 = vector.shape_cast %10 : vector<16x256xf32> to vector<1x16x256xf32>
    tpu.vector_store %arg6[%c0_5, %c0_6, %c0_7], %13 {strides = array<i32>} : memref<1x16x256xf32, #tpu.memory_space<vmem>>, vector<1x16x256xf32>,
    return
  }
  func.func @transform_0(%arg0: i32, %arg1: i32, %arg2: i32) -> (i32, i32) {
    %c0_i32 = arith.constant 0 : i32
    %c0_i32_0 = arith.constant 0 : i32
    return %arg0, %c0_i32 : i32, i32
  }
  func.func @transform_1(%arg0: i32, %arg1: i32, %arg2: i32) -> (i32, i32) {
    %c0_i32 = arith.constant 0 : i32
    %c0_i32_0 = arith.constant 0 : i32
    return %c0_i32, %arg1 : i32, i32
  }
  func.func @transform_2(%arg0: i32, %arg1: i32, %arg2: i32) -> (i32, i32) {
    %c0_i32 = arith.constant 0 : i32
    %c0_i32_0 = arith.constant 0 : i32
    return %c0_i32, %arg1 : i32, i32
  }
  func.func @transform_3(%arg0: i32, %arg1: i32, %arg2: i32) -> (i32, i32, i32) {
    %c0_i32 = arith.constant 0 : i32
    return %arg2, %arg0, %arg1 : i32, i32, i32
  }
}

module attributes {stable_mosaic.version = 11 : i64} {
  func.func @_bilm_two_layer_kernel(%arg0: i32, %arg1: memref<16x256xf32, #tpu.memory_space<vmem>>, %arg2: memref<256x256xbf16, #tpu.memory_space<vmem>>, %arg3: memref<1x256xf32, #tpu.memory_space<vmem>>, %arg4: memref<256x256xbf16, #tpu.memory_space<vmem>>, %arg5: memref<1x256xf32, #tpu.memory_space<vmem>>, %arg6: memref<16x1xf32, #tpu.memory_space<vmem>>, %arg7: memref<16x256xf32, #tpu.memory_space<vmem>>, %arg8: memref<16x256xf32, #tpu.memory_space<vmem>>) attributes {dimension_semantics = [#tpu.dimension_semantics<parallel>], iteration_bounds = array<i64: 2>, scalar_prefetch = 0 : i64, scratch_operands = 0 : i64, tpu.core_type = #tpu.core_type<tc>, window_params = [{transform_indices = @transform_0, window_bounds = array<i64: 16, 256>}, {pipeline_mode = #tpu.pipeline_mode<synchronous>, transform_indices = @transform_1, window_bounds = array<i64: 256, 256>}, {pipeline_mode = #tpu.pipeline_mode<synchronous>, transform_indices = @transform_2, window_bounds = array<i64: 1, 256>}, {pipeline_mode = #tpu.pipeline_mode<synchronous>, transform_indices = @transform_3, window_bounds = array<i64: 256, 256>}, {pipeline_mode = #tpu.pipeline_mode<synchronous>, transform_indices = @transform_4, window_bounds = array<i64: 1, 256>}, {transform_indices = @transform_5, window_bounds = array<i64: 16, 1>}, {transform_indices = @transform_6, window_bounds = array<i64: 16, 256>}, {transform_indices = @transform_7, window_bounds = array<i64: 16, 256>}]} {
    %c0 = arith.constant 0 : index
    %c0_0 = arith.constant 0 : index
    %0 = vector.load %arg6[%c0, %c0_0] : memref<16x1xf32, #tpu.memory_space<vmem>>, vector<16x1xf32>
    %1 = vector.shape_cast %0 : vector<16x1xf32> to vector<16x1xf32>
    %2 = vector.broadcast %1 : vector<16x1xf32> to vector<16x256xf32>
    %c0_1 = arith.constant 0 : index
    %c0_2 = arith.constant 0 : index
    %3 = vector.load %arg1[%c0_1, %c0_2] : memref<16x256xf32, #tpu.memory_space<vmem>>, vector<16x256xf32>
    %4 = arith.truncf %3 : vector<16x256xf32> to vector<16x256xbf16>
    %c0_3 = arith.constant 0 : index
    %c0_4 = arith.constant 0 : index
    %5 = vector.load %arg2[%c0_3, %c0_4] : memref<256x256xbf16, #tpu.memory_space<vmem>>, vector<256x256xbf16>
    %cst = arith.constant dense<0.000000e+00> : vector<16x256xf32>
    %6 = tpu.matmul %4, %5, %cst {dimension_numbers = #tpu.dot_dimension_numbers<[1], [0], [0], [1], [0, 0, 1, 1], [], []>} : vector<16x256xbf16>, vector<256x256xbf16>, vector<16x256xf32> -> vector<16x256xf32>
    %c0_5 = arith.constant 0 : index
    %c0_6 = arith.constant 0 : index
    %7 = vector.load %arg3[%c0_5, %c0_6] : memref<1x256xf32, #tpu.memory_space<vmem>>, vector<1x256xf32>
    %8 = vector.broadcast %7 : vector<1x256xf32> to vector<16x256xf32>
    %9 = arith.addf %6, %8 : vector<16x256xf32>
    %10 = math.tanh %9 : vector<16x256xf32>
    %11 = arith.mulf %10, %2 : vector<16x256xf32>
    %c0_7 = arith.constant 0 : index
    %c0_8 = arith.constant 0 : index
    %12 = vector.load %arg7[%c0_7, %c0_8] : memref<16x256xf32, #tpu.memory_space<vmem>>, vector<16x256xf32>
    tpu.vector_store %arg7[%c0_7, %c0_8], %11 {strides = array<i32>} : memref<16x256xf32, #tpu.memory_space<vmem>>, vector<16x256xf32>,
    %13 = arith.truncf %11 : vector<16x256xf32> to vector<16x256xbf16>
    %c0_9 = arith.constant 0 : index
    %c0_10 = arith.constant 0 : index
    %14 = vector.load %arg4[%c0_9, %c0_10] : memref<256x256xbf16, #tpu.memory_space<vmem>>, vector<256x256xbf16>
    %cst_11 = arith.constant dense<0.000000e+00> : vector<16x256xf32>
    %15 = tpu.matmul %13, %14, %cst_11 {dimension_numbers = #tpu.dot_dimension_numbers<[1], [0], [0], [1], [0, 0, 1, 1], [], []>} : vector<16x256xbf16>, vector<256x256xbf16>, vector<16x256xf32> -> vector<16x256xf32>
    %c0_12 = arith.constant 0 : index
    %c0_13 = arith.constant 0 : index
    %16 = vector.load %arg5[%c0_12, %c0_13] : memref<1x256xf32, #tpu.memory_space<vmem>>, vector<1x256xf32>
    %17 = vector.broadcast %16 : vector<1x256xf32> to vector<16x256xf32>
    %18 = arith.addf %15, %17 : vector<16x256xf32>
    %19 = math.tanh %18 : vector<16x256xf32>
    %20 = arith.mulf %19, %2 : vector<16x256xf32>
    %c0_14 = arith.constant 0 : index
    %c0_15 = arith.constant 0 : index
    %21 = vector.load %arg8[%c0_14, %c0_15] : memref<16x256xf32, #tpu.memory_space<vmem>>, vector<16x256xf32>
    tpu.vector_store %arg8[%c0_14, %c0_15], %20 {strides = array<i32>} : memref<16x256xf32, #tpu.memory_space<vmem>>, vector<16x256xf32>,
    return
  }
  func.func @transform_0(%arg0: i32) -> (i32, i32) {
    %c0_i32 = arith.constant 0 : i32
    %c0_i32_0 = arith.constant 0 : i32
    return %arg0, %c0_i32 : i32, i32
  }
  func.func @transform_1(%arg0: i32) -> (i32, i32) {
    %c0_i32 = arith.constant 0 : i32
    %c0_i32_0 = arith.constant 0 : i32
    %c0_i32_1 = arith.constant 0 : i32
    return %c0_i32, %c0_i32_0 : i32, i32
  }
  func.func @transform_2(%arg0: i32) -> (i32, i32) {
    %c0_i32 = arith.constant 0 : i32
    %c0_i32_0 = arith.constant 0 : i32
    %c0_i32_1 = arith.constant 0 : i32
    return %c0_i32, %c0_i32_0 : i32, i32
  }
  func.func @transform_3(%arg0: i32) -> (i32, i32) {
    %c0_i32 = arith.constant 0 : i32
    %c0_i32_0 = arith.constant 0 : i32
    %c0_i32_1 = arith.constant 0 : i32
    return %c0_i32, %c0_i32_0 : i32, i32
  }
  func.func @transform_4(%arg0: i32) -> (i32, i32) {
    %c0_i32 = arith.constant 0 : i32
    %c0_i32_0 = arith.constant 0 : i32
    %c0_i32_1 = arith.constant 0 : i32
    return %c0_i32, %c0_i32_0 : i32, i32
  }
  func.func @transform_5(%arg0: i32) -> (i32, i32) {
    %c0_i32 = arith.constant 0 : i32
    %c0_i32_0 = arith.constant 0 : i32
    return %arg0, %c0_i32 : i32, i32
  }
  func.func @transform_6(%arg0: i32) -> (i32, i32) {
    %c0_i32 = arith.constant 0 : i32
    %c0_i32_0 = arith.constant 0 : i32
    return %arg0, %c0_i32 : i32, i32
  }
  func.func @transform_7(%arg0: i32) -> (i32, i32) {
    %c0_i32 = arith.constant 0 : i32
    %c0_i32_0 = arith.constant 0 : i32
    return %arg0, %c0_i32 : i32, i32
  }
}

</mosaic_0001>

<bundles_post_ra>
// kernel: elmo_lm_forward.3
= control target key start
LH: loop header
LB: loop body
LE: loop exit
PB: predicated region body
PF: predicated region fallthrough
CT: control target
= control target key end

     0   :  { %s682_s12 = smov 0   ;;  %s684_s13 = smov 0   ;;  %s780_s0 = inlined_call_operand.vmem [shape: f32[16,256], index: 0, kind: input, shape index: {}]   ;;  %s781_s1 = inlined_call_operand.vmem [shape: bf16[128,256], index: 1, kind: input, shape index: {}]   ;;  %s782_s2 = inlined_call_operand.vmem [shape: f32[1,256], index: 2, kind: input, shape index: {}]   ;;  %s783_s3 = inlined_call_operand.vmem [shape: f32[2,16,256], index: 3, kind: output, shape index: {}]  }
   0x1   :  { %s686_s14 = smov 0  }
   0x2 LB: > { %s25_s15 = sadd.s32 1, %s655_s13  ;;  %p566_p0 = scmp.ge.s32.totalorder %s659_s14, 1  ;;  %s659_s14 = sphi %s686_s14, %s13_s14   ;;  %s655_s13 = sphi %s684_s13, %s785_s13   ;;  %s651_s12 = sphi %s682_s12, %s784_s12  }
   0x3   : > { %p26_p1 = scmp.ge.s32.totalorder %s25_s15, 2  ;;  %p183_p2 = scmp.lt.s32.totalorder %s659_s14, 3 }
   0x5   : > { %s787_s15 = smov (%p26_p1, %s25_s15), 0  ;;  %p184_p3 = pnand %p566_p0, %p183_p2 }
   0x6   : > { %p265_p4 = scmp.eq.s32.totalorder (!%p184_p3), %s651_s12, 0  ;;  %p246_p5 = scmp.lt.s32.totalorder (!%p184_p3), %s651_s12, 1 }
   0x7   : > { %187 = sbr.rel (%p184_p3) target bundleno = 247 (0xf7), region = 32 }
   0xc   : > { %v613_v0 = vld [vmem:[%s781_s1 + $0x74] ss:$8 sps:$4 sm:$0xff]   ;;  %v615_v1 = vld [vmem:[%s781_s1 + $0x70] ss:$8 sps:$4 sm:$0xff]   ;;  %v661_v2 = vmov 0   ;;  %v261_v17 = vld [vmem:[%s780_s0] sm:$0xff]  ;;  %v290_v25 = vlaneseq }
   0xd   : > { %412 = vmatprep.mubr.bf16.mxu0 %v661_v2  ;;  %380 = vmatprep.subr.bf16.mxu0 %v613_v0  ;;  %v616_v3 = vld [vmem:[%s781_s1 + $0x64] ss:$8 sps:$4 sm:$0xff]   ;;  %v618_v4 = vld [vmem:[%s781_s1 + $0x60] ss:$8 sps:$4 sm:$0xff]   ;;  %v619_v5 = vld [vmem:[%s781_s1 + $0x54] ss:$8 sps:$4 sm:$0xff]  }
   0xe   : > { %381 = vmatpush1.bf16.msra.mxu0 %v615_v1  ;;  %v621_v6 = vld [vmem:[%s781_s1 + $0x50] ss:$8 sps:$4 sm:$0xff]   ;;  %v622_v7 = vld [vmem:[%s781_s1 + $0x44] ss:$8 sps:$4 sm:$0xff]   ;;  %v624_v8 = vld [vmem:[%s781_s1 + $0x40] ss:$8 sps:$4 sm:$0xff]  }
   0xf   : > { %382 = vmatprep.subr.bf16.mxu0 %v616_v3  ;;  %v625_v9 = vld [vmem:[%s781_s1 + $0x34] ss:$8 sps:$4 sm:$0xff]   ;;  %v627_v10 = vld [vmem:[%s781_s1 + $0x30] ss:$8 sps:$4 sm:$0xff]   ;;  %v628_v11 = vld [vmem:[%s781_s1 + $0x24] ss:$8 sps:$4 sm:$0xff]  }
  0x10   : > { %s266_s11 = scalar_select %p265_p4, 1, 0  ;;  %v630_v12 = vld [vmem:[%s781_s1 + $0x20] ss:$8 sps:$4 sm:$0xff]   ;;  %v631_v13 = vld [vmem:[%s781_s1 + $0x14] ss:$8 sps:$4 sm:$0xff]  }
  0x11   : > { %v633_v15 = vld [vmem:[%s781_s1 + $0x10] ss:$8 sps:$4 sm:$0xff]   ;;  %v634_v16 = vld [vmem:[%s781_s1 + $0x4] ss:$8 sps:$4 sm:$0xff]   ;;  %v636_v21 = vld [vmem:[%s781_s1] ss:$8 sps:$4 sm:$0xff]  }
  0x12   : > { %383 = vmatpush1.bf16.msra.mxu0 %v618_v4  ;;  %v267_v14 = vstv %s266_s11  ;;  %v262_v18 = vld [vmem:[%s780_s0 + $0x8] sm:$0xff]  ;;  %v263_v19 = vld [vmem:[%s780_s0 + $0x10] sm:$0xff]  ;;  %v264_v20 = vld [vmem:[%s780_s0 + $0x18] sm:$0xff]  ;;  %v291_v26 = vshrl.u32 %v290_v25, 7  ;;  %s789_s12 = smov (!%p246_p5, %s651_s12), 1 }
  0x13   : > { %384 = vmatprep.subr.bf16.mxu0 %v619_v5  ;;  %vm268_vm0 = vcmp.eq.s32.totalorder %v267_v14, 1  ;;  %v288_v28 = vld [vmem:[%s782_s2] sm:$0x3]  ;;  %s587_s9 = sshll.u32 %s789_s12, 5 }
  0x14   : > { %v269_v22 = vsel %vm268_vm0, %v261_v17, %v262_v18  ;;  %v270_v23 = vsel %vm268_vm0, %v263_v19, %v264_v20  ;;  %v292_v27 = vsub.s32 0, %v291_v26  ;;  %v296_v29 = vsub.s32 1, %v291_v26  ;;  %s257_s16 = scalar_lea.vmem %s783_s3, %s587_s9 }
  0x15   : > { %v271_v24 = vpack.c.bf16 %v270_v23, %v269_v22 }
  0x16   : > { %385 = vmatpush1.bf16.msra.mxu0 %v621_v6  ;;  %v293_v30 = vrot.slane %v288_v28, %v292_v27  ;;  %v297_v31 = vrot.slane %v288_v28, %v296_v29 }
  0x17   : > { %386 = vmatprep.subr.bf16.mxu0 %v622_v7 }
  0x1a   : > { %387 = vmatpush1.bf16.msra.mxu0 %v624_v8 }
  0x1b   : > { %388 = vmatprep.subr.bf16.mxu0 %v625_v9 }
  0x1e   : > { %389 = vmatpush1.bf16.msra.mxu0 %v627_v10 }
  0x1f   : > { %390 = vmatprep.subr.bf16.mxu0 %v628_v11 }
  0x22   : > { %391 = vmatpush1.bf16.msra.mxu0 %v630_v12 }
  0x23   : > { %392 = vmatprep.subr.bf16.mxu0 %v631_v13 }
  0x26   : > { %393 = vmatpush1.bf16.msra.mxu0 %v633_v15 }
  0x27   : > { %394 = vmatprep.subr.bf16.mxu0 %v634_v16 }
  0x2a   : > { %395 = vmatpush1.bf16.msra.mxu0 %v636_v21 }
  0x2d   : > { %413 = vmatmul.mubr.bf16.vlgmr.msra.gmra.mxu0 %v271_v24 }
  0xed   : > { %v414_v32 = vpop.f32.mrf.mxu0 }
  0xee   : > { %v415_v33 = vadd.f32 %v414_v32, %v293_v30 }
  0xef   : > { %v416_v34 = vpop.f32.mrf.mxu0 }
  0xf0   : > { %423 = vst [vmem:[%s257_s16] sm:$0xff] %v415_v33  ;;  %v417_v35 = vadd.f32 %v416_v34, %v297_v31 }
  0xf1   : > { %v418_v36 = vpop.f32.mrf.mxu0 }
  0xf2   : > { %424 = vst [vmem:[%s257_s16 + $0x8] sm:$0xff] %v417_v35  ;;  %v419_v37 = vadd.f32 %v418_v36, %v293_v30 }
  0xf3   : > { %v420_v38 = vpop.f32.mrf.mxu0 }
  0xf4   : > { %425 = vst [vmem:[%s257_s16 + $0x10] sm:$0xff] %v419_v37  ;;  %v421_v39 = vadd.f32 %v420_v38, %v297_v31 }
  0xf6   : > { %426 = vst [vmem:[%s257_s16 + $0x18] sm:$0xff] %v421_v39 }
  0xf7 PF: > { %s13_s14 = sadd.s32 1, %s659_s14   ;;  %s784_s12 = smov %s655_s13 }
  0xf8   : > { %p10_p6 = scmp.ge.s32.totalorder %s13_s14, 4   ;;  %s785_s13 = smov %s787_s15 }
  0xfa   :  { %12 = sbr.rel (!%p10_p6) target bundleno = 2 (0x2), region = 68 }

// kernel: elmo_lm_forward.2
= control target key start
LH: loop header
LB: loop body
LE: loop exit
PB: predicated region body
PF: predicated region fallthrough
CT: control target
= control target key end

     0   :  { %s1225_s24 = smov 0   ;;  %s1457_s0 = inlined_call_operand.vmem [shape: f32[32,256], index: 0, kind: input, shape index: {}]   ;;  %s1458_s1 = inlined_call_operand.vmem [shape: bf16[256,256], index: 1, kind: input, shape index: {}]   ;;  %s1459_s2 = inlined_call_operand.vmem [shape: f32[1,256], index: 2, kind: input, shape index: {}]   ;;  %s1460_s3 = inlined_call_operand.vmem [shape: bf16[256,256], index: 3, kind: input, shape index: {}]   ;;  %s1461_s4 = inlined_call_operand.vmem [shape: f32[1,256], index: 4, kind: input, shape index: {}]   ;;  %s1462_s5 = inlined_call_operand.vmem [shape: f32[32,1], index: 5, kind: input, shape index: {}]   ;;  %s1463_s6 = inlined_call_operand.vmem [shape: f32[32,256], index: 6, kind: output, shape index: {0}]   ;;  %s1464_s7 = inlined_call_operand.vmem [shape: f32[32,256], index: 7, kind: output, shape index: {1}]  }
   0x1 LB: > { %s969_s25 = sadd.s32 4294967295, %s1182_s24   ;;  %p973_p0 = scmp.ge.s32.totalorder %s1182_s24, 1  ;;  %s1182_s24 = sphi %s1225_s24, %s18_s24  }
   0x2   : > { %p253_p1 = scmp.lt.s32.totalorder %s1182_s24, 3 }
   0x4   : > { %p254_p2 = pnand %p973_p0, %p253_p1 }
   0x5   : > { %s974_s13 = sshll.u32 (!%p254_p2), %s969_s25, 1 }
   0x6   : > { %257 = sbr.rel (%p254_p2) target bundleno = 514 (0x202), region = 44  ;;  %p299_p3 = scmp.lt.s32.totalorder (!%p254_p2), %s974_s13, 3 }
   0xb   : > { %v1064_v0 = vld [vmem:[%s1458_s1 + $0x74] ss:$8 sps:$4 sm:$0xff]   ;;  %v1066_v1 = vld [vmem:[%s1458_s1 + $0x70] ss:$8 sps:$4 sm:$0xff]   ;;  %v1184_v2 = vmov 0   ;;  %s1466_s13 = smov (!%p299_p3, %s974_s13), 3 }
   0xc   : > { %1063 = vset.pattern.permute.xlu0 %v1184_v2  ;;  %547 = vmatprep.subr.bf16.mxu0 %v1064_v0  ;;  %v1067_v3 = vld [vmem:[%s1458_s1 + $0x64] ss:$8 sps:$4 sm:$0xff]   ;;  %v1069_v4 = vld [vmem:[%s1458_s1 + $0x60] ss:$8 sps:$4 sm:$0xff]   ;;  %v1070_v5 = vld [vmem:[%s1458_s1 + $0x54] ss:$8 sps:$4 sm:$0xff]  }
   0xd   : > { %548 = vmatpush1.bf16.msra.mxu0 %v1066_v1  ;;  %v1072_v6 = vld [vmem:[%s1458_s1 + $0x50] ss:$8 sps:$4 sm:$0xff]   ;;  %v1073_v7 = vld [vmem:[%s1458_s1 + $0x44] ss:$8 sps:$4 sm:$0xff]   ;;  %v1075_v8 = vld [vmem:[%s1458_s1 + $0x40] ss:$8 sps:$4 sm:$0xff]  }
   0xe   : > { %549 = vmatprep.subr.bf16.mxu0 %v1067_v3  ;;  %v1076_v9 = vld [vmem:[%s1458_s1 + $0x34] ss:$8 sps:$4 sm:$0xff]   ;;  %v1078_v10 = vld [vmem:[%s1458_s1 + $0x30] ss:$8 sps:$4 sm:$0xff]   ;;  %s1263_s25 = sshll.u32 %s1466_s13, 4  ;;  %s978_s28 = sshll.u32 %s1466_s13, 3 }
   0xf   : > { %v1079_v11 = vld [vmem:[%s1458_s1 + $0x24] ss:$8 sps:$4 sm:$0xff]   ;;  %s1272_s8 = scalar_lea.vmem %s1457_s0, %s1263_s25  ;;  %v1081_v12 = vld [vmem:[%s1458_s1 + $0x20] ss:$8 sps:$4 sm:$0xff]   ;;  %s309_s14 = scalar_lea.vmem %s1462_s5, %s978_s28  ;;  %v1082_v13 = vld [vmem:[%s1458_s1 + $0x14] ss:$8 sps:$4 sm:$0xff]  }
  0x10   : > { %v338_v14 = vld [vmem:[%s1272_s8 + $0x8] sm:$0xff]  ;;  %v340_v15 = vld [vmem:[%s1272_s8 + $0x18] sm:$0xff]  ;;  %v325_v19 = vld [vmem:[%s309_s14] sm:$0xff]  ;;  %s316_s20 = scalar_lea.vmem %s1463_s6, %s1263_s25  ;;  %s323_s27 = scalar_lea.vmem %s1464_s7, %s1263_s25 }
  0x11   : > { %550 = vmatpush1.bf16.msra.mxu0 %v1069_v4  ;;  %v1084_v16 = vld [vmem:[%s1458_s1 + $0x10] ss:$8 sps:$4 sm:$0xff]   ;;  %v1085_v17 = vld [vmem:[%s1458_s1 + $0x4] ss:$8 sps:$4 sm:$0xff]   ;;  %v342_v18 = vpack.c.bf16 %v340_v15, %v338_v14  ;;  %329 = vperm.xlu0 %1063, %v325_v19   ;;  %v1112_v21 = vld [vmem:[%s1460_s3 + $0x74] ss:$8 sps:$4 sm:$0xff]  }
  0x12   : > { %551 = vmatprep.subr.bf16.mxu0 %v1070_v5  ;;  %v326_v20 = vld [vmem:[%s309_s14 + $0x8] sm:$0xff]  ;;  %v1114_v22 = vld [vmem:[%s1460_s3 + $0x70] ss:$8 sps:$4 sm:$0xff]   ;;  %808 = vmatprep.subr.bf16.mxu1 %v1112_v21  ;;  %v1088_v25 = vld [vmem:[%s1458_s1 + $0xf4] ss:$8 sps:$4 sm:$0xff]  }
  0x13   : > { %579 = vmatprep.mubr.bf16.mxu0 %v342_v18  ;;  %v1115_v23 = vld [vmem:[%s1460_s3 + $0x64] ss:$8 sps:$4 sm:$0xff]   ;;  %v1087_v24 = vld [vmem:[%s1458_s1] ss:$8 sps:$4 sm:$0xff]   ;;  %809 = vmatpush1.bf16.msra.mxu1 %v1114_v22  ;;  %v1118_v27 = vld [vmem:[%s1460_s3 + $0x54] ss:$8 sps:$4 sm:$0xff]  }
  0x14   : > { %v1117_v26 = vld [vmem:[%s1460_s3 + $0x60] ss:$8 sps:$4 sm:$0xff]   ;;  %810 = vmatprep.subr.bf16.mxu1 %v1115_v23  ;;  %v1090_v28 = vld [vmem:[%s1458_s1 + $0xf0] ss:$8 sps:$4 sm:$0xff]   ;;  %v1091_v29 = vld [vmem:[%s1458_s1 + $0xe4] ss:$8 sps:$4 sm:$0xff]  }
  0x15   : > { %552 = vmatpush1.bf16.msra.mxu0 %v1072_v6  ;;  %334 = vperm.xlu0 %1063, %v326_v20   ;;  %v1120_v30 = vld [vmem:[%s1460_s3 + $0x50] ss:$8 sps:$4 sm:$0xff]   ;;  %v1093_v31 = vld [vmem:[%s1458_s1 + $0xe0] ss:$8 sps:$4 sm:$0xff]   ;;  %v1121_v32 = vld [vmem:[%s1460_s3 + $0x44] ss:$8 sps:$4 sm:$0xff]  }
  0x16   : > { %553 = vmatprep.subr.bf16.mxu0 %v1073_v7  ;;  %v1094_v33 = vld [vmem:[%s1458_s1 + $0xd4] ss:$8 sps:$4 sm:$0xff]   ;;  %v1123_v34 = vld [vmem:[%s1460_s3 + $0x40] ss:$8 sps:$4 sm:$0xff]   ;;  %v1096_v36 = vld [vmem:[%s1458_s1 + $0xd0] ss:$8 sps:$4 sm:$0xff]  }
  0x17   : > { %811 = vmatpush1.bf16.msra.mxu1 %v1117_v26  ;;  %v1124_v35 = vld [vmem:[%s1460_s3 + $0x34] ss:$8 sps:$4 sm:$0xff]   ;;  %v1097_v37 = vld [vmem:[%s1458_s1 + $0xc4] ss:$8 sps:$4 sm:$0xff]   ;;  %v1126_v38 = vld [vmem:[%s1460_s3 + $0x30] ss:$8 sps:$4 sm:$0xff]  }
  0x18   : > { %812 = vmatprep.subr.bf16.mxu1 %v1118_v27  ;;  %v1127_v39 = vld [vmem:[%s1460_s3 + $0x24] ss:$8 sps:$4 sm:$0xff]   ;;  %v1099_v40 = vld [vmem:[%s1458_s1 + $0xc0] ss:$8 sps:$4 sm:$0xff]   ;;  %v1100_v41 = vld [vmem:[%s1458_s1 + $0xb4] ss:$8 sps:$4 sm:$0xff]  }
  0x19   : > { %554 = vmatpush1.bf16.msra.mxu0 %v1075_v8  ;;  %v1129_v42 = vld [vmem:[%s1460_s3 + $0x20] ss:$8 sps:$4 sm:$0xff]   ;;  %v1130_v43 = vld [vmem:[%s1460_s3 + $0x14] ss:$8 sps:$4 sm:$0xff]   ;;  %v1102_v44 = vld [vmem:[%s1458_s1 + $0xb0] ss:$8 sps:$4 sm:$0xff]  }
  0x1a   : > { %555 = vmatprep.subr.bf16.mxu0 %v1076_v9  ;;  %v1103_v45 = vld [vmem:[%s1458_s1 + $0xa4] ss:$8 sps:$4 sm:$0xff]   ;;  %v1132_v46 = vld [vmem:[%s1460_s3 + $0x10] ss:$8 sps:$4 sm:$0xff]   ;;  %v1105_v48 = vld [vmem:[%s1458_s1 + $0xa0] ss:$8 sps:$4 sm:$0xff]   ;;  %v377_v9 = vlaneseq }
  0x1b   : > { %813 = vmatpush1.bf16.msra.mxu1 %v1120_v30  ;;  %v1133_v47 = vld [vmem:[%s1460_s3 + $0x4] ss:$8 sps:$4 sm:$0xff]   ;;  %v1106_v49 = vld [vmem:[%s1458_s1 + $0x94] ss:$8 sps:$4 sm:$0xff]   ;;  %v1135_v50 = vld [vmem:[%s1460_s3] ss:$8 sps:$4 sm:$0xff]  }
  0x1c   : > { %814 = vmatprep.subr.bf16.mxu1 %v1121_v32  ;;  %v1136_v51 = vld [vmem:[%s1460_s3 + $0xf4] ss:$8 sps:$4 sm:$0xff]   ;;  %v1108_v52 = vld [vmem:[%s1458_s1 + $0x90] ss:$8 sps:$4 sm:$0xff]   ;;  %v1109_v53 = vld [vmem:[%s1458_s1 + $0x84] ss:$8 sps:$4 sm:$0xff]  }
  0x1d   : > { %556 = vmatpush1.bf16.msra.mxu0 %v1078_v10  ;;  %v1138_v54 = vld [vmem:[%s1460_s3 + $0xf0] ss:$8 sps:$4 sm:$0xff]   ;;  %v1111_v55 = vld [vmem:[%s1458_s1 + $0x80] ss:$8 sps:$4 sm:$0xff]   ;;  %v1139_v59 = vld [vmem:[%s1460_s3 + $0xe4] ss:$8 sps:$4 sm:$0xff]  }
  0x1e   : > { %557 = vmatprep.subr.bf16.mxu0 %v1079_v11  ;;  %v337_v56 = vld [vmem:[%s1272_s8] sm:$0xff]  ;;  %v339_v57 = vld [vmem:[%s1272_s8 + $0x10] sm:$0xff]  ;;  %v378_v10 = vshrl.u32 %v377_v9, 7 }
  0x1f   : > { %815 = vmatpush1.bf16.msra.mxu1 %v1123_v34  ;;  %v341_v58 = vpack.c.bf16 %v339_v57, %v337_v56  ;;  %v1141_v60 = vld [vmem:[%s1460_s3 + $0xe0] ss:$8 sps:$4 sm:$0xff]   ;;  %v1142_v61 = vld [vmem:[%s1460_s3 + $0xd4] ss:$8 sps:$4 sm:$0xff]   ;;  %v1144_v62 = vld [vmem:[%s1460_s3 + $0xd0] ss:$8 sps:$4 sm:$0xff]  }
  0x20   : > { %816 = vmatprep.subr.bf16.mxu1 %v1124_v35  ;;  %v1145_v63 = vld [vmem:[%s1460_s3 + $0xc4] ss:$8 sps:$4 sm:$0xff]   ;;  %v1147_v0 = vld [vmem:[%s1460_s3 + $0xc0] ss:$8 sps:$4 sm:$0xff]   ;;  %v1148_v1 = vld [vmem:[%s1460_s3 + $0xb4] ss:$8 sps:$4 sm:$0xff]  }
  0x21   : > { %558 = vmatpush1.bf16.msra.mxu0 %v1081_v12  ;;  %v1150_v2 = vld [vmem:[%s1460_s3 + $0xb0] ss:$8 sps:$4 sm:$0xff]   ;;  %v1151_v3 = vld [vmem:[%s1460_s3 + $0xa4] ss:$8 sps:$4 sm:$0xff]   ;;  %v1153_v4 = vld [vmem:[%s1460_s3 + $0xa0] ss:$8 sps:$4 sm:$0xff]  }
  0x22   : > { %559 = vmatprep.subr.bf16.mxu0 %v1082_v13  ;;  %v1154_v5 = vld [vmem:[%s1460_s3 + $0x94] ss:$8 sps:$4 sm:$0xff]   ;;  %v1156_v6 = vld [vmem:[%s1460_s3 + $0x90] ss:$8 sps:$4 sm:$0xff]   ;;  %v1157_v7 = vld [vmem:[%s1460_s3 + $0x84] ss:$8 sps:$4 sm:$0xff]  }
  0x23   : > { %817 = vmatpush1.bf16.msra.mxu1 %v1126_v38  ;;  %v1159_v8 = vld [vmem:[%s1460_s3 + $0x80] ss:$8 sps:$4 sm:$0xff]   ;;  %v379_v11 = vsub.s32 0, %v378_v10  ;;  %v383_v13 = vsub.s32 1, %v378_v10 }
  0x24   : > { %818 = vmatprep.subr.bf16.mxu1 %v1127_v39  ;;  %v375_v12 = vld [vmem:[%s1459_s2] sm:$0x3] }
  0x25   : > { %560 = vmatpush1.bf16.msra.mxu0 %v1084_v16  ;;  %v380_v14 = vrot.slane %v375_v12, %v379_v11  ;;  %v384_v15 = vrot.slane %v375_v12, %v383_v13 }
  0x26   : > { %561 = vmatprep.subr.bf16.mxu0 %v1085_v17 }
  0x27   : > { %819 = vmatpush1.bf16.msra.mxu1 %v1129_v42 }
  0x28   : > { %820 = vmatprep.subr.bf16.mxu1 %v1130_v43 }
  0x29   : > { %562 = vmatpush1.bf16.msra.mxu0 %v1087_v24 }
  0x2a   : > { %563 = vmatprep.subr.bf16.mxu0 %v1088_v25 }
  0x2b   : > { %821 = vmatpush1.bf16.msra.mxu1 %v1132_v46 }
  0x2c   : > { %822 = vmatprep.subr.bf16.mxu1 %v1133_v47 }
  0x2d   : > { %564 = vmatpush2.bf16.msra.mxu0 %v1090_v28 }
  0x2e   : > { %565 = vmatprep.subr.bf16.mxu0 %v1091_v29 }
  0x2f   : > { %823 = vmatpush1.bf16.msra.mxu1 %v1135_v50 }
  0x30   : > { %824 = vmatprep.subr.bf16.mxu1 %v1136_v51 }
  0x31   : > { %566 = vmatpush2.bf16.msra.mxu0 %v1093_v31 }
  0x32   : > { %567 = vmatprep.subr.bf16.mxu0 %v1094_v33 }
  0x33   : > { %825 = vmatpush2.bf16.msra.mxu1 %v1138_v54 }
  0x34   : > { %826 = vmatprep.subr.bf16.mxu1 %v1139_v59 }
  0x35   : > { %568 = vmatpush2.bf16.msra.mxu0 %v1096_v36  ;;  %v636_v36 = vld [vmem:[%s1461_s4] sm:$0x3] }
  0x36   : > { %569 = vmatprep.subr.bf16.mxu0 %v1097_v37  ;;  %v641_v37 = vrot.slane %v636_v36, %v379_v11  ;;  %v645_v38 = vrot.slane %v636_v36, %v383_v13 }
  0x37   : > { %827 = vmatpush2.bf16.msra.mxu1 %v1141_v60 }
  0x38   : > { %828 = vmatprep.subr.bf16.mxu1 %v1142_v61 }
  0x39   : > { %570 = vmatpush2.bf16.msra.mxu0 %v1099_v40 }
  0x3a   : > { %571 = vmatprep.subr.bf16.mxu0 %v1100_v41 }
  0x3b   : > { %829 = vmatpush2.bf16.msra.mxu1 %v1144_v62 }
  0x3c   : > { %830 = vmatprep.subr.bf16.mxu1 %v1145_v63 }
  0x3d   : > { %572 = vmatpush2.bf16.msra.mxu0 %v1102_v44 }
  0x3e   : > { %573 = vmatprep.subr.bf16.mxu0 %v1103_v45 }
  0x3f   : > { %831 = vmatpush2.bf16.msra.mxu1 %v1147_v0 }
  0x40   : > { %832 = vmatprep.subr.bf16.mxu1 %v1148_v1 }
  0x41   : > { %574 = vmatpush2.bf16.msra.mxu0 %v1105_v48 }
  0x42   : > { %575 = vmatprep.subr.bf16.mxu0 %v1106_v49 }
  0x43   : > { %833 = vmatpush2.bf16.msra.mxu1 %v1150_v2 }
  0x44   : > { %834 = vmatprep.subr.bf16.mxu1 %v1151_v3 }
  0x45   : > { %576 = vmatpush2.bf16.msra.mxu0 %v1108_v52 }
  0x46   : > { %577 = vmatprep.subr.bf16.mxu0 %v1109_v53 }
  0x47   : > { %835 = vmatpush2.bf16.msra.mxu1 %v1153_v4 }
  0x48   : > { %836 = vmatprep.subr.bf16.mxu1 %v1154_v5 }
  0x49   : > { %578 = vmatpush2.bf16.msra.mxu0 %v1111_v55 }
  0x4b   : > { %837 = vmatpush2.bf16.msra.mxu1 %v1156_v6 }
  0x4c   : > { %580 = vmatmul.mubr.bf16.vlgmr.msra.gmra.mxu0 %v341_v58  ;;  %838 = vmatprep.subr.bf16.mxu1 %v1157_v7 }
  0x4f   : > { %839 = vmatpush2.bf16.msra.mxu1 %v1159_v8 }
  0x8c   : > { %v330_v24 = vpop.permute.xlu0 %329 }
  0x90   : > { %v335_v30 = vpop.permute.xlu0 %334 }
 0x10c   : > { %v581_v16 = vpop.f32.mrf.mxu0 }
 0x10d   : > { %v582_v17 = vadd.f32 %v581_v16, %v380_v14 }
 0x10e   : > { %v583_v18 = vpop.f32.mrf.mxu0 }
 0x10f   : > { %1160 = vtanh.f32 %v582_v17  ;;  %v584_v19 = vadd.f32 %v583_v18, %v384_v15 }
 0x110   : > { %v585_v20 = vpop.f32.mrf.mxu0 }
 0x111   : > { %1162 = vtanh.f32 %v584_v19  ;;  %v586_v21 = vadd.f32 %v585_v20, %v380_v14 }
 0x112   : > { %v587_v22 = vpop.f32.mrf.mxu0 }
 0x113   : > { %1164 = vtanh.f32 %v586_v21  ;;  %v588_v23 = vadd.f32 %v587_v22, %v384_v15 }
 0x115   : > { %1166 = vtanh.f32 %v588_v23 }
 0x11c   : > { %v1161_v25 = vpop.eup %1160 }
 0x11d   : > { %v594_v26 = vmul.f32 %v1161_v25, %v330_v24 }
 0x11e   : > { %v1163_v27 = vpop.eup %1162 }
 0x11f   : > { %598 = vst [vmem:[%s316_s20] sm:$0xff] %v594_v26  ;;  %v595_v28 = vmul.f32 %v1163_v27, %v330_v24 }
 0x120   : > { %v1165_v29 = vpop.eup %1164 }
 0x121   : > { %v596_v31 = vmul.f32 %v1165_v29, %v335_v30  ;;  %599 = vst [vmem:[%s316_s20 + $0x8] sm:$0xff] %v595_v28 }
 0x122   : > { %v1167_v32 = vpop.eup %1166 }
 0x123   : > { %600 = vst [vmem:[%s316_s20 + $0x10] sm:$0xff] %v596_v31  ;;  %v597_v33 = vmul.f32 %v1167_v32, %v335_v30  ;;  %v602_v35 = vpack.c.bf16 %v596_v31, %v594_v26 }
 0x125   : > { %601 = vst [vmem:[%s316_s20 + $0x18] sm:$0xff] %v597_v33  ;;  %v603_v34 = vpack.c.bf16 %v597_v33, %v595_v28 }
 0x127   : > { %840 = vmatprep.mubr.bf16.mxu1 %v603_v34 }
 0x128   : > { %841 = vmatmul.mubr.bf16.vlgmr.msra.gmra.mxu1 %v602_v35 }
 0x1e8   : > { %v842_v39 = vpop.f32.mrf.mxu1 }
 0x1e9   : > { %v843_v40 = vadd.f32 %v842_v39, %v641_v37 }
 0x1ea   : > { %v844_v41 = vpop.f32.mrf.mxu1 }
 0x1eb   : > { %1168 = vtanh.f32 %v843_v40  ;;  %v845_v42 = vadd.f32 %v844_v41, %v645_v38 }
 0x1ec   : > { %v846_v43 = vpop.f32.mrf.mxu1 }
 0x1ed   : > { %1170 = vtanh.f32 %v845_v42  ;;  %v847_v44 = vadd.f32 %v846_v43, %v641_v37 }
 0x1ee   : > { %v848_v45 = vpop.f32.mrf.mxu1 }
 0x1ef   : > { %1172 = vtanh.f32 %v847_v44  ;;  %v849_v46 = vadd.f32 %v848_v45, %v645_v38 }
 0x1f1   : > { %1174 = vtanh.f32 %v849_v46 }
 0x1f8   : > { %v1169_v47 = vpop.eup %1168 }
 0x1f9   : > { %v855_v48 = vmul.f32 %v1169_v47, %v330_v24 }
 0x1fa   : > { %v1171_v49 = vpop.eup %1170 }
 0x1fb   : > { %859 = vst [vmem:[%s323_s27] sm:$0xff] %v855_v48  ;;  %v856_v50 = vmul.f32 %v1171_v49, %v330_v24 }
 0x1fc   : > { %v1173_v51 = vpop.eup %1172 }
 0x1fd   : > { %860 = vst [vmem:[%s323_s27 + $0x8] sm:$0xff] %v856_v50  ;;  %v857_v52 = vmul.f32 %v1173_v51, %v335_v30 }
 0x1fe   : > { %v1175_v53 = vpop.eup %1174 }
 0x1ff   : > { %861 = vst [vmem:[%s323_s27 + $0x10] sm:$0xff] %v857_v52  ;;  %v858_v54 = vmul.f32 %v1175_v53, %v335_v30 }
 0x201   : > { %862 = vst [vmem:[%s323_s27 + $0x18] sm:$0xff] %v858_v54 }
 0x202 PF: > { %s18_s24 = sadd.s32 1, %s1182_s24  }
 0x203   : > { %p15_p4 = scmp.ge.s32.totalorder %s18_s24, 4  }
 0x205   :  { %17 = sbr.rel (!%p15_p4) target bundleno = 1 (0x1), region = 89 }

</bundles_post_ra>
